<compile_context>
chip_gen: v7x
topology: tpu7x:2x2x1
jax: 0.10.0
libtpu: 0.0.40
codegen_flags: <defaults>
</compile_context>

<pallas_src>
import functools

import jax
import jax.numpy as jnp
from jax.experimental import pallas as pl
from jax.experimental.pallas import tpu as pltpu


def _round_up(x, m):
    return (x + m - 1) // m * m


def _cdiv(a, b):
    return (a + b - 1) // b


_VMEM_CAP_CACHE = None


def _vmem_capacity():
    """Physical VMEM bytes per core; conservative 64 MiB fallback (v7x-safe)."""
    global _VMEM_CAP_CACHE
    if _VMEM_CAP_CACHE is None:
        try:
            _VMEM_CAP_CACHE = int(pltpu.get_tpu_info().vmem_capacity_bytes)
        except Exception:
            _VMEM_CAP_CACHE = 64 << 20
    return _VMEM_CAP_CACHE


# --------------------------------------------------------------------------
# Kernels
# --------------------------------------------------------------------------
def _ffn_kernel_f32out(x_ref, w1_ref, b1_ref, w2_ref, b2_ref, o_ref):
    """Accumulate directly into the (f32) output tile; no scratch needed."""
    j = pl.program_id(1)

    @pl.when(j == 0)
    def _():
        o_ref[...] = jnp.broadcast_to(b2_ref[...].astype(o_ref.dtype), o_ref.shape)

    # h_j = relu(x @ W1[:, j-tile] + b1[j-tile])   (bf16 MXU feed, f32 accumulate)
    h = jnp.dot(x_ref[...], w1_ref[...], preferred_element_type=jnp.float32)
    h = jnp.maximum(h + b1_ref[...].astype(jnp.float32), 0.0)

    # out += h_j @ W2[j-tile, :]   (cast only for the MXU feed)
    o_ref[...] += jnp.dot(h.astype(w2_ref.dtype), w2_ref[...],
                          preferred_element_type=jnp.float32)


def _ffn_kernel_acc(x_ref, w1_ref, b1_ref, w2_ref, b2_ref, o_ref, acc_ref):
    """Scratch f32 accumulator variant for non-f32 output dtypes."""
    j = pl.program_id(1)

    @pl.when(j == 0)
    def _():
        acc_ref[...] = jnp.zeros_like(acc_ref)

    h = jnp.dot(x_ref[...], w1_ref[...], preferred_element_type=jnp.float32)
    h = jnp.maximum(h + b1_ref[...].astype(jnp.float32), 0.0)
    acc_ref[...] += jnp.dot(h.astype(w2_ref.dtype), w2_ref[...],
                            preferred_element_type=jnp.float32)

    @pl.when(j == pl.num_programs(1) - 1)
    def _():
        o_ref[...] = (acc_ref[...] + b2_ref[...].astype(jnp.float32)
                      ).astype(o_ref.dtype)


# --------------------------------------------------------------------------
# Tile selection (Python-level, shape/dtype dependent only)
# --------------------------------------------------------------------------
def _select_tiles(M, C, H, x_bytes, w_bytes, out_bytes, tm):
    Cp = _round_up(C, 128)                      # lane-dense K / output dim
    H128 = _round_up(H, 128)

    # Row tiling: minimal padding, >=2 row tiles when possible (v7x megacore).
    grid0 = max(_cdiv(M, tm), 2 if M >= 16 else 1)
    tm_e = _round_up(_cdiv(M, grid0), 8)
    Mp = grid0 * tm_e

    vmem_cap = _vmem_capacity()
    budget = int(0.60 * vmem_cap)               # keep headroom for pipelining

    acc_bytes = 0 if out_bytes == 4 else 4 * tm_e * Cp
    fixed = (2 * tm_e * Cp * x_bytes            # x tile (double buffered)
             + 2 * tm_e * Cp * out_bytes        # out tile
             + acc_bytes                        # f32 scratch (bf16-out path)
             + 2 * Cp * 4)                      # b2
    per_h = 2 * 2 * Cp * w_bytes + 2 * 4        # W1 + W2 (x2 buffers) + b1, per column
    avail = max(budget - fixed, per_h * 128)
    th_max = avail // per_h

    if th_max >= H128:
        th_e, Hp = H128, H128                   # weights fully resident, one j step
    else:
        th_cap = max(128, (th_max // 128) * 128)
        grid1 = _cdiv(H128, th_cap)
        th_e = _round_up(_cdiv(H128, grid1), 128)
        Hp = grid1 * th_e

    resident = fixed + per_h * th_e
    vmem_limit = int(min(max(resident + (8 << 20), 32 << 20),
                         int(0.9 * vmem_cap)))
    return tm_e, th_e, Mp, Cp, Hp, vmem_limit


# --------------------------------------------------------------------------
# Jitted implementation
# --------------------------------------------------------------------------
@functools.partial(
    jax.jit,
    static_argnames=("tm_e", "th_e", "Mp", "Cp", "Hp", "vmem_limit",
                     "compute_dtype"))
def _ffn_impl(x2, w1, b1, w2, b2, *, tm_e, th_e, Mp, Cp, Hp, vmem_limit,
              compute_dtype):
    M, C = x2.shape
    H = w1.shape[1]
    cd = compute_dtype
    out_dtype = x2.dtype

    # ---- cast + zero-pad to TPU-friendly shapes ----------------------------
    xs = x2.astype(cd)
    if (Mp, Cp) != (M, C):
        xs = jnp.pad(xs, ((0, Mp - M), (0, Cp - C)))
    w1p = w1.astype(cd)
    if (Cp, Hp) != (C, H):
        w1p = jnp.pad(w1p, ((0, Cp - C), (0, Hp - H)))
    w2p = w2.astype(cd)
    if (Hp, Cp) != (H, C):
        w2p = jnp.pad(w2p, ((0, Hp - H), (0, Cp - C)))
    b1p = b1.reshape(1, -1).astype(jnp.float32)
    if Hp != H:
        b1p = jnp.pad(b1p, ((0, 0), (0, Hp - H)))
    b2p = b2.reshape(1, -1).astype(jnp.float32)
    if Cp != C:
        b2p = jnp.pad(b2p, ((0, 0), (0, Cp - C)))

    grid0, grid1 = Mp // tm_e, Hp // th_e

    if out_dtype == jnp.float32:
        kernel = _ffn_kernel_f32out
        scratch = []
    else:
        kernel = _ffn_kernel_acc
        scratch = [pltpu.VMEM((tm_e, Cp), jnp.float32)]

    xb = jnp.dtype(cd).itemsize
    wb = jnp.dtype(cd).itemsize
    ob = jnp.dtype(out_dtype).itemsize
    cost = pl.CostEstimate(
        flops=4 * Mp * Cp * Hp,                 # two matmuls, 2 flops / MAC
        transcendentals=0,
        bytes_accessed=int(xb * Mp * Cp + ob * Mp * Cp
                           + grid0 * (wb * 2 * Cp * Hp + 4 * (Hp + Cp))))

    out = pl.pallas_call(
        kernel,
        out_shape=jax.ShapeDtypeStruct((Mp, Cp), out_dtype),
        grid=(grid0, grid1),
        in_specs=[
            pl.BlockSpec((tm_e, Cp), lambda i, j: (i, 0)),    # x row tile
            pl.BlockSpec((Cp, th_e), lambda i, j: (0, j)),    # W1 column tile
            pl.BlockSpec((1, th_e), lambda i, j: (0, j)),     # b1 tile
            pl.BlockSpec((th_e, Cp), lambda i, j: (j, 0)),    # W2 row tile
            pl.BlockSpec((1, Cp), lambda i, j: (0, 0)),       # b2 (constant)
        ],
        out_specs=pl.BlockSpec((tm_e, Cp), lambda i, j: (i, 0)),
        scratch_shapes=scratch,
        compiler_params=pltpu.CompilerParams(
            dimension_semantics=("parallel", "arbitrary"),
            vmem_limit_bytes=vmem_limit),
        cost_estimate=cost,
    )(xs, w1p, b1p, w2p, b2p)

    return out[:M, :C]


def feed_forward(x, w1, b1, w2, b2, *, tm=512, compute_dtype=jnp.bfloat16):
    """x: (B, T, C) -> (B, T, C). Equivalent to PyTorch FeedFoward in eval mode."""
    B, T, C = x.shape
    H = w1.shape[1]                              # 4 * n_embd
    M = B * T
    cbytes = jnp.dtype(compute_dtype).itemsize
    obytes = jnp.dtype(x.dtype).itemsize
    tm_e, th_e, Mp, Cp, Hp, vmem_limit = _select_tiles(
        M, C, H, cbytes, cbytes, obytes, tm)
    y = _ffn_impl(x.reshape(M, C), w1, b1, w2, b2,
                  tm_e=tm_e, th_e=th_e, Mp=Mp, Cp=Cp, Hp=Hp,
                  vmem_limit=vmem_limit, compute_dtype=compute_dtype)
    return y.reshape(B, T, C)


# --------------------------------------------------------------------------
# Init + reference + self-test
# --------------------------------------------------------------------------
def init_params(key, n_embd):
    """Deterministic init matching nn.Linear's default uniform(+-1/sqrt(fan_in))."""
    k1, k2, k3, k4 = jax.random.split(key, 4)
    hidden = 4 * n_embd
    lim1 = 1.0 / (n_embd ** 0.5)
    lim2 = 1.0 / (hidden ** 0.5)
    w1 = jax.random.uniform(k1, (n_embd, hidden), jnp.float32, -lim1, lim1)
    b1 = jax.random.uniform(k2, (1, hidden), jnp.float32, -lim1, lim1)
    w2 = jax.random.uniform(k3, (hidden, n_embd), jnp.float32, -lim2, lim2)
    b2 = jax.random.uniform(k4, (1, n_embd), jnp.float32, -lim2, lim2)
    return w1, b1, w2, b2


def _reference(x, w1, b1, w2, b2, compute_dtype=jnp.float32):
    """Matches the kernel's numerics: inputs rounded to compute_dtype, f32 math."""
    B, T, C = x.shape
    cd = compute_dtype
    xf = x.reshape(-1, C).astype(cd)
    h = jnp.maximum(jnp.dot(xf, w1.astype(cd), preferred_element_type=jnp.float32)
                    + b1.reshape(1, -1).astype(jnp.float32), 0.0)
    y = (jnp.dot(h.astype(cd), w2.astype(cd), preferred_element_type=jnp.float32)
         + b2.reshape(1, -1).astype(jnp.float32))
    return y.reshape(B, T, C).astype(x.dtype)


if __name__ == "__main__":
    key = jax.random.PRNGKey(0)

    # Case 1: toy shape (B=2, T=8, n_embd=32 -> hidden=128); default bf16 MXU
    # feeds, f32 accumulate, f32 output (in-place accumulator kernel).
    kx, kp = jax.random.split(key)
    B, T, n_embd = 2, 8, 32
    dropout = 0.1  # eval-mode no-op
    x = jax.random.normal(kx, (B, T, n_embd), jnp.float32)
    w1, b1, w2, b2 = init_params(kp, n_embd)
    y = feed_forward(x, w1, b1, w2, b2)
    jax.block_until_ready(y)
    ref = _reference(x, w1, b1, w2, b2, jnp.bfloat16)
    assert jnp.allclose(y, ref, atol=5e-3, rtol=5e-3), \
        float(jnp.max(jnp.abs(y - ref)))

    # Case 2: ragged shape exercising M/C/H padding, exact f32 compute path.
    kx2, kp2 = jax.random.split(jax.random.PRNGKey(1))
    B2, T2, n_embd2 = 2, 7, 48
    x2 = jax.random.normal(kx2, (B2, T2, n_embd2), jnp.float32)
    w1b, b1b, w2b, b2b = init_params(kp2, n_embd2)
    y2 = feed_forward(x2, w1b, b1b, w2b, b2b, compute_dtype=jnp.float32)
    jax.block_until_ready(y2)
    ref2 = _reference(x2, w1b, b1b, w2b, b2b, jnp.float32)
    assert jnp.allclose(y2, ref2, atol=1e-5, rtol=1e-5), \
        float(jnp.max(jnp.abs(y2 - ref2)))

    # Case 3: bf16 activations/output — exercises the scratch-accumulator kernel.
    xb16 = x.astype(jnp.bfloat16)
    y3 = feed_forward(xb16, w1, b1, w2, b2)
    jax.block_until_ready(y3)
    ref3 = _reference(xb16, w1, b1, w2, b2, jnp.bfloat16)
    assert jnp.allclose(y3.astype(jnp.float32), ref3.astype(jnp.float32),
                        atol=5e-2, rtol=5e-2)

    print("KERNEL_OK")
</pallas_src>

<mosaic_0001>
module attributes {stable_mosaic.version = 11 : i64} {
  func.func @_ffn_kernel_f32out(%arg0: i32, %arg1: i32, %arg2: memref<8x128xbf16, #tpu.memory_space<vmem>>, %arg3: memref<128x128xbf16, #tpu.memory_space<vmem>>, %arg4: memref<1x128xf32, #tpu.memory_space<vmem>>, %arg5: memref<128x128xbf16, #tpu.memory_space<vmem>>, %arg6: memref<1x128xf32, #tpu.memory_space<vmem>>, %arg7: memref<8x128xf32, #tpu.memory_space<vmem>>) attributes {dimension_semantics = [#tpu.dimension_semantics<parallel>, #tpu.dimension_semantics<arbitrary>], iteration_bounds = array<i64: 2, 1>, scalar_prefetch = 0 : i64, scratch_operands = 0 : i64, tpu.core_type = #tpu.core_type<tc>, window_params = [{transform_indices = @transform_0, window_bounds = array<i64: 8, 128>}, {transform_indices = @transform_1, window_bounds = array<i64: 128, 128>}, {transform_indices = @transform_2, window_bounds = array<i64: 1, 128>}, {transform_indices = @transform_3, window_bounds = array<i64: 128, 128>}, {pipeline_mode = #tpu.pipeline_mode<synchronous>, transform_indices = @transform_4, window_bounds = array<i64: 1, 128>}, {transform_indices = @transform_5, window_bounds = array<i64: 8, 128>}]} {
    %c0_i32 = arith.constant 0 : i32
    %0 = arith.cmpi eq, %arg1, %c0_i32 : i32
    %1 = arith.extui %0 : i1 to i32
    %c0_i32_0 = arith.constant 0 : i32
    %2 = arith.cmpi ne, %1, %c0_i32_0 : i32
    scf.if %2 {
      %c0_14 = arith.constant 0 : index
      %c0_15 = arith.constant 0 : index
      %17 = vector.load %arg6[%c0_14, %c0_15] : memref<1x128xf32, #tpu.memory_space<vmem>>, vector<1x128xf32>
      %18 = vector.shape_cast %17 : vector<1x128xf32> to vector<1x128xf32>
      %19 = vector.broadcast %18 : vector<1x128xf32> to vector<8x128xf32>
      %c0_16 = arith.constant 0 : index
      %c0_17 = arith.constant 0 : index
      %20 = vector.load %arg7[%c0_16, %c0_17] : memref<8x128xf32, #tpu.memory_space<vmem>>, vector<8x128xf32>
      tpu.vector_store %arg7[%c0_16, %c0_17], %19 {strides = array<i32>} : memref<8x128xf32, #tpu.memory_space<vmem>>, vector<8x128xf32>,
    } else {
    }
    %c0 = arith.constant 0 : index
    %c0_1 = arith.constant 0 : index
    %3 = vector.load %arg2[%c0, %c0_1] : memref<8x128xbf16, #tpu.memory_space<vmem>>, vector<8x128xbf16>
    %c0_2 = arith.constant 0 : index
    %c0_3 = arith.constant 0 : index
    %4 = vector.load %arg3[%c0_2, %c0_3] : memref<128x128xbf16, #tpu.memory_space<vmem>>, vector<128x128xbf16>
    %cst = arith.constant dense<0.000000e+00> : vector<8x128xf32>
    %5 = tpu.matmul %3, %4, %cst {dimension_numbers = #tpu.dot_dimension_numbers<[1], [0], [0], [1], [0, 0, 1, 1], [], []>} : vector<8x128xbf16>, vector<128x128xbf16>, vector<8x128xf32> -> vector<8x128xf32>
    %c0_4 = arith.constant 0 : index
    %c0_5 = arith.constant 0 : index
    %6 = vector.load %arg4[%c0_4, %c0_5] : memref<1x128xf32, #tpu.memory_space<vmem>>, vector<1x128xf32>
    %7 = vector.broadcast %6 : vector<1x128xf32> to vector<8x128xf32>
    %8 = arith.addf %5, %7 : vector<8x128xf32>
    %cst_6 = arith.constant 0.000000e+00 : f32
    %9 = vector.broadcast %cst_6 : f32 to vector<8x128xf32>
    %10 = arith.maximumf %8, %9 : vector<8x128xf32>
    %c0_7 = arith.constant 0 : index
    %c0_8 = arith.constant 0 : index
    %11 = vector.load %arg7[%c0_7, %c0_8] : memref<8x128xf32, #tpu.memory_space<vmem>>, vector<8x128xf32>
    %12 = arith.truncf %10 : vector<8x128xf32> to vector<8x128xbf16>
    %c0_9 = arith.constant 0 : index
    %c0_10 = arith.constant 0 : index
    %13 = vector.load %arg5[%c0_9, %c0_10] : memref<128x128xbf16, #tpu.memory_space<vmem>>, vector<128x128xbf16>
    %cst_11 = arith.constant dense<0.000000e+00> : vector<8x128xf32>
    %14 = tpu.matmul %12, %13, %cst_11 {dimension_numbers = #tpu.dot_dimension_numbers<[1], [0], [0], [1], [0, 0, 1, 1], [], []>} : vector<8x128xbf16>, vector<128x128xbf16>, vector<8x128xf32> -> vector<8x128xf32>
    %15 = arith.addf %11, %14 : vector<8x128xf32>
    %c0_12 = arith.constant 0 : index
    %c0_13 = arith.constant 0 : index
    %16 = vector.load %arg7[%c0_12, %c0_13] : memref<8x128xf32, #tpu.memory_space<vmem>>, vector<8x128xf32>
    tpu.vector_store %arg7[%c0_12, %c0_13], %15 {strides = array<i32>} : memref<8x128xf32, #tpu.memory_space<vmem>>, vector<8x128xf32>,
    return
  }
  func.func @transform_0(%arg0: i32, %arg1: i32) -> (i32, i32) {
    %c0_i32 = arith.constant 0 : i32
    %c0_i32_0 = arith.constant 0 : i32
    return %arg0, %c0_i32 : i32, i32
  }
  func.func @transform_1(%arg0: i32, %arg1: i32) -> (i32, i32) {
    %c0_i32 = arith.constant 0 : i32
    %c0_i32_0 = arith.constant 0 : i32
    return %c0_i32, %arg1 : i32, i32
  }
  func.func @transform_2(%arg0: i32, %arg1: i32) -> (i32, i32) {
    %c0_i32 = arith.constant 0 : i32
    %c0_i32_0 = arith.constant 0 : i32
    return %c0_i32, %arg1 : i32, i32
  }
  func.func @transform_3(%arg0: i32, %arg1: i32) -> (i32, i32) {
    %c0_i32 = arith.constant 0 : i32
    %c0_i32_0 = arith.constant 0 : i32
    return %arg1, %c0_i32 : i32, i32
  }
  func.func @transform_4(%arg0: i32, %arg1: i32) -> (i32, i32) {
    %c0_i32 = arith.constant 0 : i32
    %c0_i32_0 = arith.constant 0 : i32
    %c0_i32_1 = arith.constant 0 : i32
    return %c0_i32, %c0_i32_0 : i32, i32
  }
  func.func @transform_5(%arg0: i32, %arg1: i32) -> (i32, i32) {
    %c0_i32 = arith.constant 0 : i32
    %c0_i32_0 = arith.constant 0 : i32
    return %arg0, %c0_i32 : i32, i32
  }
}

</mosaic_0001>

<bundles_post_ra>
// kernel: _ffn_impl.1
= control target key start
LH: loop header
LB: loop body
LE: loop exit
PB: predicated region body
PF: predicated region fallthrough
CT: control target
= control target key end

     0   :  { %10 = vsyncpa [#allocation3], 0  ;;  %s1084_s0 = inlined_call_operand.vmem [shape: bf16[16,128], index: 0, kind: input, shape index: {}]   ;;  %s1085_s1 = inlined_call_operand.vmem [shape: bf16[128,128], index: 1, kind: input, shape index: {}]   ;;  %s1086_s2 = inlined_call_operand.vmem [shape: f32[1,128], index: 2, kind: input, shape index: {}]   ;;  %s1087_s3 = inlined_call_operand.vmem [shape: bf16[128,128], index: 3, kind: input, shape index: {}]   ;;  %s1088_s4 = inlined_call_operand.vmem [shape: f32[1,128], index: 4, kind: input, shape index: {}]   ;;  %s1089_s5 = inlined_call_operand.hbm [shape: f32[16,128], index: 5, kind: output, shape index: {}]  }
   0x1   :  { %12 = vsyncpa [#allocation3 + $0x1], 0  ;;  %s918_s18 = smov 0   ;;  %s920_s19 = smov 0  }
   0x2   :  { %s922_s20 = smov 0   ;;  %s924_s21 = smov 0  }
   0x3   :  { %s926_s22 = smov 0   ;;  %s928_s23 = smov 0  }
   0x4 LB: > { %s642_s24 = sadd.s32 4294967295, %s883_s23   ;;  %s643_s25 = sadd.s32 4294967294, %s883_s23   ;;  %s883_s23 = sphi %s928_s23, %s18_s23   ;;  %s879_s22 = sphi %s926_s22, %s1096_s22   ;;  %s875_s21 = sphi %s924_s21, %s1095_s21   ;;  %s871_s20 = sphi %s922_s20, %s1094_s20   ;;  %s867_s19 = sphi %s920_s19, %s1093_s19   ;;  %s863_s18 = sphi %s918_s18, %s1092_s18  }
   0x5   : > { %s30_s26 = sadd.s32 1, %s879_s22  ;;  %s162_s27 = sadd.s32 1, %s871_s20 }
   0x6   : > { %p32_p0 = scmp.ge.s32.totalorder %s30_s26, 2  ;;  %p172_p1 = scmp.ne.s32.totalorder %s871_s20, %s867_s19 }
   0x7   : > { %p173_p2 = scmp.eq.s32.totalorder %s642_s24, 1  ;;  %p178_p3 = scmp.ne.s32.totalorder %s867_s19, %s863_s18 }
   0x8   : > { %s1098_s26 = smov (%p32_p0, %s30_s26), 0  ;;  %p179_p5 = scmp.eq.s32.totalorder %s643_s25, 1 }
   0x9   : > { %p958_p4 = por %p173_p2, %p172_p1  ;;  %s159_s29 = ssub.s32 %s879_s22, %s1098_s26 }
   0xa   : > { %p649_p6 = scmp.ge.s32.totalorder %s883_s23, 1  ;;  %p160_p7 = scmp.eq.s32.totalorder %s159_s29, 0 }
   0xb   : > { %p965_p8 = por %p179_p5, %p178_p3  ;;  %p229_p9 = scmp.lt.s32.totalorder %s883_s23, 3 }
   0xc   : > { %s971_s6 = scalar_select %p160_p7, %s871_s20, %s162_s27  }
   0xd   : > { %p230_p10 = pnand %p649_p6, %p229_p9 }
   0xe   : > { %v789_v0 = vld [vmem:[%s1085_s1] sm:$0xff] (!%p230_p10)   ;;  %v885_v1 = vmov (!%p230_p10), 0.0   ;;  %v790_v2 = vld [vmem:[%s1085_s1 + $0x8] sm:$0xff] (!%p230_p10)   ;;  %vm886_vm0 = vmmov (!%p230_p10), 0   ;;  %v791_v3 = vld [vmem:[%s1085_s1 + $0x10] sm:$0xff] (!%p230_p10)   ;;  %p268_p11 = scmp.lt.s32.totalorder (!%p230_p10), %s875_s21, 1 }
   0xf   : > { %233 = sbr.rel (%p230_p10) target bundleno = 493 (0x1ed), region = 40  ;;  %692 = vmatprep.subr.bf16.mxu0 (!%p230_p10), %v885_v1  ;;  %712 = vmatprep.subr.bf16.mxu1 (!%p230_p10), %v885_v1  ;;  %v797_v4 = vld [vmem:[%s1087_s3] sm:$0xff] (!%p230_p10)   ;;  %v792_v5 = vld [vmem:[%s1085_s1 + $0x18] sm:$0xff] (!%p230_p10)   ;;  %v798_v6 = vld [vmem:[%s1087_s3 + $0x8] sm:$0xff] (!%p230_p10)   ;;  %s265_s16 = sand.u32 (!%p230_p10), 1, %s867_s19  }
  0x10   : > { %693 = vmatpush3.bf16.msra.mxu0 (!%p230_p10), %v789_v0  ;;  %708 = vmatprep.mubr.msk.bf16.mxu0 (!%p230_p10), %vm886_vm0, %v885_v1  ;;  %v793_v7 = vld [vmem:[%s1085_s1 + $0x20] sm:$0xff] (!%p230_p10)   ;;  %v799_v8 = vld [vmem:[%s1087_s3 + $0x10] sm:$0xff] (!%p230_p10)   ;;  %v794_v9 = vld [vmem:[%s1085_s1 + $0x28] sm:$0xff] (!%p230_p10)   ;;  %s671_s27 = sshll.u32 (!%p230_p10), %s875_s21, 7  ;;  %s520_s11 = scalar_lea.sflag (!%p230_p10), [#allocation3], %s265_s16 }
  0x11   : > { %694 = vmatprep.subr.bf16.mxu0 (!%p230_p10), %v885_v1  ;;  %728 = vmatprep.mubr.msk.bf16.mxu1 (!%p230_p10), %vm886_vm0, %v885_v1  ;;  %v800_v10 = vld [vmem:[%s1087_s3 + $0x18] sm:$0xff] (!%p230_p10)   ;;  %v795_v11 = vld [vmem:[%s1085_s1 + $0x30] sm:$0xff] (!%p230_p10)   ;;  %v801_v12 = vld [vmem:[%s1087_s3 + $0x20] sm:$0xff] (!%p230_p10)   ;;  %s1037_s10 = scalar_lea.hbm (!%p230_p10), %s1089_s5, %s671_s27 }
  0x12   : > { %713 = vmatpush3.bf16.msra.mxu1 (!%p230_p10), %v797_v4  ;;  %v796_v13 = vld [vmem:[%s1085_s1 + $0x38] sm:$0xff] (!%p230_p10)   ;;  %v802_v14 = vld [vmem:[%s1087_s3 + $0x28] sm:$0xff] (!%p230_p10)   ;;  %v803_v16 = vld [vmem:[%s1087_s3 + $0x30] sm:$0xff] (!%p230_p10)  }
  0x13   : > { %714 = vmatprep.subr.bf16.mxu1 (!%p230_p10), %v885_v1  ;;  %v804_v17 = vld [vmem:[%s1087_s3 + $0x38] sm:$0xff] (!%p230_p10)   ;;  %v653_v18 = vld [vmem:[%s1086_s2] ss:$0 sm:$0xff] (!%p230_p10) }
  0x14   : > { %695 = vmatpush3.bf16.msra.mxu0 (!%p230_p10), %v790_v2  ;;  %v652_v26 = vld [vmem:[%s1088_s4] ss:$0 sm:$0xff] (!%p230_p10) }
  0x15   : > { %696 = vmatprep.subr.bf16.mxu0 (!%p230_p10), %v885_v1 }
  0x16   : > { %715 = vmatpush3.bf16.msra.mxu1 %v798_v6  ;;  %s269_s12 = scalar_select %p268_p11, %s875_s21, 1 }
  0x17   : > { %716 = vmatprep.subr.bf16.mxu1 %v885_v1 }
  0x18   : > { %697 = vmatpush3.bf16.msra.mxu0 %v791_v3  ;;  %s651_s17 = sshll.u32 %s269_s12, 2  ;;  %s887_s12 = smov [#allocation2]  }
  0x19   : > { %698 = vmatprep.subr.bf16.mxu0 %v885_v1  ;;  %s271_s7 = scalar_lea.vmem %s1084_s0, %s651_s17  ;;  %s650_s17 = sshll.u32 %s265_s16, 3 }
  0x1a   : > { %717 = vmatpush3.bf16.msra.mxu1 %v799_v8  ;;  %v298_v15 = vld [vmem:[%s271_s7] sm:$0xf]  ;;  %s267_s29 = scalar_lea.vmem [#allocation2], %s650_s17  ;;  %s809_s13 = sshll.u32 %s887_s12, 4  ;;  %s810_s13 = int_to_ptr.vmem [resolvable:$false] %s809_s13 }
  0x1b   : > { %718 = vmatprep.subr.bf16.mxu1 %v885_v1  ;;  %s533_s7 = sshll.u32 %s267_s29, 4  ;;  %s811_s14 = scalar_lea.vmem %s810_s13, 256  ;;  %s1039_s7 = int_to_ptr.vmem [resolvable:$true] %s533_s7 }
  0x1c   : > { %699 = vmatpush3.bf16.msra.mxu0 %v792_v5  ;;  %s805_s21 = scalar_lea.vmem %s1039_s7, 128  ;;  %p812_p1 = scmp.lt.s32.totalorder %s1039_s7, %s810_s13 }
  0x1d   : > { %700 = vmatprep.subr.bf16.mxu0 %v885_v1  ;;  %p806_p12 = scmp.ne.s32.totalorder %s1039_s7, %s805_s21  ;;  %p813_p2 = scmp.lt.s32.totalorder %s811_s14, %s805_s21 }
  0x1e   : > { %719 = vmatpush3.bf16.msra.mxu1 %v800_v10 }
  0x1f   : > { %720 = vmatprep.subr.bf16.mxu1 %v885_v1  ;;  %p807_p13 = pnand %p806_p12, %p958_p4  ;;  %p814_p3 = por %p813_p2, %p812_p1 }
  0x20   : > { %701 = vmatpush3.bf16.msra.mxu0 %v793_v7 }
  0x21   : > { %702 = vmatprep.subr.bf16.mxu0 %v885_v1  ;;  %p808_p0 = pneg %p807_p13 }
  0x22   : > { %721 = vmatpush3.bf16.msra.mxu1 %v801_v12 }
  0x23   : > { %722 = vmatprep.subr.bf16.mxu1 %v885_v1  ;;  %p815_p5 = pnand %p814_p3, %p808_p0 }
  0x24   : > { %703 = vmatpush3.bf16.msra.mxu0 %v794_v9 }
  0x25   : > { %704 = vmatprep.subr.bf16.mxu0 %v885_v1 }
  0x26   : > { %723 = vmatpush3.bf16.msra.mxu1 %v802_v14 }
  0x27   : > { %724 = vmatprep.subr.bf16.mxu1 %v885_v1 }
  0x28   : > { %705 = vmatpush3.bf16.msra.mxu0 %v795_v11 }
  0x29   : > { %706 = vmatprep.subr.bf16.mxu0 %v885_v1 }
  0x2a   : > { %725 = vmatpush3.bf16.msra.mxu1 %v803_v16 }
  0x2b   : > { %726 = vmatprep.subr.bf16.mxu1 %v885_v1 }
  0x2c   : > { %707 = vmatpush3.bf16.msra.mxu0 %v796_v13 }
  0x2e   : > { %727 = vmatpush3.bf16.msra.mxu1 %v804_v17 }
  0x2f   : > { %709 = vmatmul.mubr.bf16.vlgmr.msra.gmra.mrb[0].mxu0 %v298_v15 }
 0x102   : > { %v404_v19 = vpop.f32.mrb[0].mxu0 }
 0x103   : > { %v405_v20 = vadd.f32 %v653_v18, %v404_v19  ;;  %v710_v21 = vpop.f32.mrb[1].mxu0 }
 0x104   : > { %v407_v22 = vpop.f32.mrb[2].mxu0 }
 0x105   : > { %v410_v23 = vmax.f32 %v405_v20, 0.0  ;;  %v711_v24 = vpop.f32.mrb[3].mxu0 }
 0x107   : > { %v412_v25 = vpack.c.bf16 %v410_v23, %v410_v23 }
 0x109   : > { %729 = vmatmul.mubr.bf16.vlgmr.msra.gmra.mrb[0].mxu1 %v412_v25 }
 0x1dc   : > { %v511_v27 = vpop.f32.mrb[0].mxu1 }
 0x1dd   : > { %v517_v28 = vadd.f32 %v652_v26, %v511_v27  ;;  %v730_v29 = vpop.f32.mrb[1].mxu1 }
 0x1de   : > { %v514_v30 = vpop.f32.mrb[2].mxu1 }
 0x1df   : > { %518 = vst [vmem:[%s267_s29] sm:$0xff] %v517_v28  ;;  %v731_v31 = vpop.f32.mrb[3].mxu1 }
 0x1e0   : > { %818 = shalt.err (!%p815_p5)
}
 0x1e1   : > { %s819_s15 = scalar_lea.hbm %s1037_s10, 128  ;;  %s823_s24 = scalar_lea.hbm %s1089_s5, 256 }
 0x1e2   : > { %p820_p6 = scmp.ne.s32.totalorder %s1037_s10, %s819_s15  ;;  %p824_p10 = scmp.lt.u32.totalorder %s1037_s10, %s1089_s5 }
 0x1e3   : > { %p825_p11 = scmp.lt.u32.totalorder %s823_s24, %s819_s15  ;;  %p827_p13 = scmp.lt.u32.totalorder %s819_s15, %s1037_s10 }
 0x1e4   : > { %p821_p7 = pnand %p820_p6, %p958_p4 }
 0x1e5   : > { %p826_p12 = por %p825_p11, %p824_p10 }
 0x1e6   : > { %p822_p9 = pneg %p821_p7 }
 0x1e7   : > { %p828_p0 = por %p827_p13, %p826_p12 }
 0x1e9   : > { %p829_p1 = pnand %p828_p0, %p822_p9 }
 0x1eb   : > { %832 = shalt.err (!%p829_p1)
}
 0x1ec   : > { %732 = dma.vmem_to_hbm [thread:$0]  (%p958_p4), %s1039_s7, 128, %s1037_s10, %s520_s11  }
 0x1ed PF: > { %p738_p2 = scmp.ge.s32.totalorder %s883_s23, 2  ;;  %s545_s29 = sand.u32 1, %s863_s18  }
 0x1ee   : > { %s546_s8 = scalar_lea.sflag [#allocation3], %s545_s29 }
 0x1ef   : > { %p735_p3 = pnand %p738_p2, %p965_p8 }
 0x1f1   : > { %858 = dma.done.wait (!%p735_p3), %s546_s8, 128  }
 0x1f2   : > { %860 = vsyncadd (!%p735_p3), %s546_s8, 4294967168  ;;  %s18_s23 = sadd.s32 1, %s883_s23   ;;  %s1092_s18 = smov %s867_s19 }
 0x1f3   : > { %p15_p5 = scmp.ge.s32.totalorder %s18_s23, 4   ;;  %s1093_s19 = smov %s871_s20 }
 0x1f4   : > { %s1094_s20 = smov %s971_s6  ;;  %s1095_s21 = smov %s879_s22 }
 0x1f5   : > { %s1096_s22 = smov %s1098_s26  ;;  %17 = sbr.rel (!%p15_p5) target bundleno = 4 (0x4), region = 88 }
 0x1fc   :  { %551 = vsyncpa [#allocation3], 1 }
 0x1fd   :  { %553 = vsyncpa [#allocation3 + $0x1], 1 }

</bundles_post_ra>
